<compile_context>
chip_gen: v6e
topology: v6e:2x2x1
jax: 0.10.0
libtpu: 0.0.40
codegen_flags: <defaults>
</compile_context>

<pallas_src>
import math

import jax
import jax.numpy as jnp
from jax.experimental import pallas as pl
from jax.experimental.pallas import tpu as pltpu


def _make_attention_kernel(seq_len, q_tile, hidden, num_heads, head_size, eps):
    scale = 1.0 / math.sqrt(head_size)

    def kernel(xq_ref, xf_ref, mask_ref,
               wq_ref, bq_ref, wk_ref, bk_ref, wv_ref, bv_ref,
               wo_ref, bo_ref, gamma_ref, beta_ref,
               out_ref):
        # xq_ref : (q_tile, H) f32  -- query rows of this tile (also residual)
        # xf_ref : (S, H)      f32  -- full sequence, used for K/V projections
        # mask_ref: (1, 1, S)  f32  -- additive mask
        xq = xq_ref[...]
        xf = xf_ref[...]
        mask = mask_ref[0]                       # (1, S)

        xq_b = xq.astype(jnp.bfloat16)
        xf_b = xf.astype(jnp.bfloat16)

        # ---- Q/K/V projections: bf16 MXU inputs, f32 accumulation ----
        q = jnp.dot(xq_b, wq_ref[...],
                    preferred_element_type=jnp.float32) + bq_ref[...]
        k = jnp.dot(xf_b, wk_ref[...],
                    preferred_element_type=jnp.float32) + bk_ref[...]
        v = jnp.dot(xf_b, wv_ref[...],
                    preferred_element_type=jnp.float32) + bv_ref[...]

        q_h = q.astype(jnp.bfloat16).reshape(q_tile, num_heads, head_size)
        k_h = k.astype(jnp.bfloat16).reshape(seq_len, num_heads, head_size)
        v_h = v.astype(jnp.bfloat16).reshape(seq_len, num_heads, head_size)

        # ---- batched per-head attention: one contraction for all heads ----
        scores = jnp.einsum("qhd,khd->hqk", q_h, k_h,
                            preferred_element_type=jnp.float32) * scale
        scores = scores + mask                   # (1,S) broadcasts over (nh,tq,S)

        # numerically stable softmax along keys, f32 math
        m = jnp.max(scores, axis=-1, keepdims=True)
        e = jnp.exp(scores - m)
        denom = jnp.sum(e, axis=-1, keepdims=True)
        probs = e * pl.reciprocal(denom, approx=True)

        ctx = jnp.einsum("hqk,khd->qhd", probs.astype(jnp.bfloat16), v_h,
                         preferred_element_type=jnp.float32)
        ctx = ctx.reshape(q_tile, hidden)        # head-major column order, as
                                                 # in permute(0,2,1,3).view(...)

        # ---- output projection + residual + LayerNorm (f32 epilogue) ----
        proj = jnp.dot(ctx.astype(jnp.bfloat16), wo_ref[...],
                       preferred_element_type=jnp.float32) + bo_ref[...]
        y = proj + xq
        mean = jnp.mean(y, axis=-1, keepdims=True)
        var = jnp.mean(jnp.square(y - mean), axis=-1, keepdims=True)
        y_norm = (y - mean) * jax.lax.rsqrt(var + eps)
        out_ref[...] = gamma_ref[...] * y_norm + beta_ref[...]

    return kernel


def _pick_q_tile(S):
    if S <= 512:
        return S
    for t in (512, 256, 128):
        if S % t == 0:
            return t
    return S


def protein_bert_attention(hidden_states, attention_mask, params, *,
                           num_heads, eps=1e-12, q_tile=None):
    """hidden_states: (B, S, H) f32; attention_mask: (B, 1, 1, S) f32."""
    B, S, H = hidden_states.shape
    assert H % num_heads == 0
    head_size = H // num_heads

    if q_tile is None:
        q_tile = _pick_q_tile(S)
    assert S % q_tile == 0
    n_q = S // q_tile

    kernel = _make_attention_kernel(S, q_tile, H, num_heads, head_size, eps)

    # Ship the big (H, H) weights to VMEM in bf16 (half the footprint / DMA).
    wq = params["wq"].astype(jnp.bfloat16)
    wk = params["wk"].astype(jnp.bfloat16)
    wv = params["wv"].astype(jnp.bfloat16)
    wo = params["wo"].astype(jnp.bfloat16)

    # Replicated (grid-invariant) parameter blocks.
    rep = lambda shape: pl.BlockSpec(shape, lambda b, qi: (0,) * len(shape))

    in_specs = [
        # query tile of x (also the residual input) -- batch dim squeezed out
        pl.BlockSpec((None, q_tile, H), lambda b, qi: (b, qi, 0)),
        # full-sequence x for K/V (block index constant across qi -> no re-DMA)
        pl.BlockSpec((None, S, H), lambda b, qi: (b, 0, 0)),
        # additive attention mask (1, 1, S) after squeezing batch
        pl.BlockSpec((None, 1, 1, S), lambda b, qi: (b, 0, 0, 0)),
        rep((H, H)), rep((1, H)),     # Wq, bq
        rep((H, H)), rep((1, H)),     # Wk, bk
        rep((H, H)), rep((1, H)),     # Wv, bv
        rep((H, H)), rep((1, H)),     # Wo, bo
        rep((1, H)), rep((1, H)),     # gamma, beta
    ]
    out_spec = pl.BlockSpec((None, q_tile, H), lambda b, qi: (b, qi, 0))

    # Advisory cost estimate for the XLA scheduler.
    flops = B * (2 * S * H * H                     # Q projection (all tiles)
                 + n_q * 2 * 2 * S * H * H         # K/V (recomputed per q-tile)
                 + 2 * 2 * S * S * H               # QK^T + probs@V
                 + 2 * S * H * H)                  # output projection
    transcendentals = B * num_heads * S * S        # exp in softmax
    bytes_accessed = (2 * B * S * H * 4            # x in + out
                      + B * S * 4                  # mask
                      + 4 * H * H * 2              # bf16 weights
                      + 8 * H * 4)                 # biases / gamma / beta

    fn = pl.pallas_call(
        kernel,
        out_shape=jax.ShapeDtypeStruct((B, S, H), jnp.float32),
        grid_spec=pltpu.PrefetchScalarGridSpec(
            num_scalar_prefetch=0,
            grid=(B, n_q),
            in_specs=in_specs,
            out_specs=out_spec,
        ),
        compiler_params=pltpu.CompilerParams(
            dimension_semantics=("parallel", "parallel"),
            vmem_limit_bytes=32 * 1024 * 1024,
        ),
        cost_estimate=pl.CostEstimate(
            flops=flops,
            transcendentals=transcendentals,
            bytes_accessed=bytes_accessed,
        ),
    )

    return fn(hidden_states, hidden_states, attention_mask,
              wq, params["bq"], wk, params["bk"], wv, params["bv"],
              wo, params["bo"], params["gamma"], params["beta"])


def reference_attention(hidden_states, attention_mask, params, *,
                        num_heads, eps=1e-12):
    """Pure-JAX f32 reference mirroring the PyTorch forward semantics."""
    B, S, H = hidden_states.shape
    d = H // num_heads
    x = hidden_states

    def lin(x, w, b):
        return jnp.einsum("bsh,hk->bsk", x, w) + b

    q = lin(x, params["wq"], params["bq"]).reshape(B, S, num_heads, d)
    k = lin(x, params["wk"], params["bk"]).reshape(B, S, num_heads, d)
    v = lin(x, params["wv"], params["bv"]).reshape(B, S, num_heads, d)
    q = q.transpose(0, 2, 1, 3)          # (B, nh, S, d)
    k = k.transpose(0, 2, 1, 3)
    v = v.transpose(0, 2, 1, 3)

    scores = jnp.einsum("bhqd,bhkd->bhqk", q, k) / math.sqrt(d)
    scores = scores + attention_mask      # (B,1,1,S) broadcasts
    probs = jax.nn.softmax(scores, axis=-1)
    ctx = jnp.einsum("bhqk,bhkd->bhqd", probs, v)
    ctx = ctx.transpose(0, 2, 1, 3).reshape(B, S, H)

    out = jnp.einsum("bsh,hk->bsk", ctx, params["wo"]) + params["bo"]
    y = out + x
    mean = jnp.mean(y, axis=-1, keepdims=True)
    var = jnp.mean((y - mean) ** 2, axis=-1, keepdims=True)
    return params["gamma"] * (y - mean) / jnp.sqrt(var + eps) + params["beta"]


if __name__ == "__main__":
    # Small config consistent with the module: hidden_size=32, heads=4, seq=8.
    B, S, H, NH = 2, 8, 32, 4

    key = jax.random.PRNGKey(0)
    ks = jax.random.split(key, 12)

    def winit(k, shape, scale=0.05):
        return (scale * jax.random.normal(k, shape)).astype(jnp.float32)

    params = {
        "wq": winit(ks[0], (H, H)), "bq": winit(ks[1], (1, H)),
        "wk": winit(ks[2], (H, H)), "bk": winit(ks[3], (1, H)),
        "wv": winit(ks[4], (H, H)), "bv": winit(ks[5], (1, H)),
        "wo": winit(ks[6], (H, H)), "bo": winit(ks[7], (1, H)),
        "gamma": jnp.ones((1, H), jnp.float32),
        "beta": jnp.zeros((1, H), jnp.float32),
    }

    hidden_states = jax.random.normal(ks[8], (B, S, H)).astype(jnp.float32)
    # Additive mask: 0 for attend, -10000 for masked (last 2 key positions of
    # batch 1 masked), shape (B, 1, 1, S) as in BERT.
    mask_bits = jnp.ones((B, S), jnp.float32).at[1, -2:].set(0.0)
    attention_mask = ((1.0 - mask_bits) * -10000.0).reshape(B, 1, 1, S)

    out = protein_bert_attention(hidden_states, attention_mask, params,
                                 num_heads=NH)
    out = jax.block_until_ready(out)

    ref = reference_attention(hidden_states, attention_mask, params,
                              num_heads=NH)
    assert out.shape == (B, S, H)
    # bf16 MXU inputs + approx reciprocal -> slightly relaxed tolerance.
    assert jnp.allclose(out, ref, atol=2e-2, rtol=2e-2), "mismatch vs reference"

    print("KERNEL_OK")
</pallas_src>

<mosaic_0001>
module attributes {stable_mosaic.version = 11 : i64} {
  func.func @kernel(%arg0: i32, %arg1: i32, %arg2: memref<1x8x32xf32, #tpu.memory_space<vmem>>, %arg3: memref<1x8x32xf32, #tpu.memory_space<vmem>>, %arg4: memref<1x1x1x8xf32, #tpu.memory_space<vmem>>, %arg5: memref<32x32xbf16, #tpu.memory_space<vmem>>, %arg6: memref<1x32xf32, #tpu.memory_space<vmem>>, %arg7: memref<32x32xbf16, #tpu.memory_space<vmem>>, %arg8: memref<1x32xf32, #tpu.memory_space<vmem>>, %arg9: memref<32x32xbf16, #tpu.memory_space<vmem>>, %arg10: memref<1x32xf32, #tpu.memory_space<vmem>>, %arg11: memref<32x32xbf16, #tpu.memory_space<vmem>>, %arg12: memref<1x32xf32, #tpu.memory_space<vmem>>, %arg13: memref<1x32xf32, #tpu.memory_space<vmem>>, %arg14: memref<1x32xf32, #tpu.memory_space<vmem>>, %arg15: memref<1x8x32xf32, #tpu.memory_space<vmem>>) attributes {dimension_semantics = [#tpu.dimension_semantics<parallel>, #tpu.dimension_semantics<parallel>], iteration_bounds = array<i64: 2, 1>, scalar_prefetch = 0 : i64, scratch_operands = 0 : i64, tpu.core_type = #tpu.core_type<tc>, window_params = [{transform_indices = @transform_0, window_bounds = array<i64: 1, 8, 32>}, {transform_indices = @transform_1, window_bounds = array<i64: 1, 8, 32>}, {transform_indices = @transform_2, window_bounds = array<i64: 1, 1, 1, 8>}, {pipeline_mode = #tpu.pipeline_mode<synchronous>, transform_indices = @transform_3, window_bounds = array<i64: 32, 32>}, {pipeline_mode = #tpu.pipeline_mode<synchronous>, transform_indices = @transform_4, window_bounds = array<i64: 1, 32>}, {pipeline_mode = #tpu.pipeline_mode<synchronous>, transform_indices = @transform_5, window_bounds = array<i64: 32, 32>}, {pipeline_mode = #tpu.pipeline_mode<synchronous>, transform_indices = @transform_6, window_bounds = array<i64: 1, 32>}, {pipeline_mode = #tpu.pipeline_mode<synchronous>, transform_indices = @transform_7, window_bounds = array<i64: 32, 32>}, {pipeline_mode = #tpu.pipeline_mode<synchronous>, transform_indices = @transform_8, window_bounds = array<i64: 1, 32>}, {pipeline_mode = #tpu.pipeline_mode<synchronous>, transform_indices = @transform_9, window_bounds = array<i64: 32, 32>}, {pipeline_mode = #tpu.pipeline_mode<synchronous>, transform_indices = @transform_10, window_bounds = array<i64: 1, 32>}, {pipeline_mode = #tpu.pipeline_mode<synchronous>, transform_indices = @transform_11, window_bounds = array<i64: 1, 32>}, {pipeline_mode = #tpu.pipeline_mode<synchronous>, transform_indices = @transform_12, window_bounds = array<i64: 1, 32>}, {transform_indices = @transform_13, window_bounds = array<i64: 1, 8, 32>}]} {
    %c0 = arith.constant 0 : index
    %c0_0 = arith.constant 0 : index
    %c0_1 = arith.constant 0 : index
    %0 = vector.load %arg2[%c0, %c0_0, %c0_1] : memref<1x8x32xf32, #tpu.memory_space<vmem>>, vector<1x8x32xf32>
    %1 = vector.shape_cast %0 : vector<1x8x32xf32> to vector<8x32xf32>
    %c0_2 = arith.constant 0 : index
    %c0_3 = arith.constant 0 : index
    %c0_4 = arith.constant 0 : index
    %2 = vector.load %arg3[%c0_2, %c0_3, %c0_4] : memref<1x8x32xf32, #tpu.memory_space<vmem>>, vector<1x8x32xf32>
    %3 = vector.shape_cast %2 : vector<1x8x32xf32> to vector<8x32xf32>
    %c0_5 = arith.constant 0 : index
    %c0_6 = arith.constant 0 : index
    %c0_7 = arith.constant 0 : index
    %c0_8 = arith.constant 0 : index
    %4 = vector.load %arg4[%c0_5, %c0_6, %c0_7, %c0_8] : memref<1x1x1x8xf32, #tpu.memory_space<vmem>>, vector<1x1x1x8xf32>
    %5 = vector.shape_cast %4 : vector<1x1x1x8xf32> to vector<1x8xf32>
    %6 = arith.truncf %1 : vector<8x32xf32> to vector<8x32xbf16>
    %7 = arith.truncf %3 : vector<8x32xf32> to vector<8x32xbf16>
    %c0_9 = arith.constant 0 : index
    %c0_10 = arith.constant 0 : index
    %8 = vector.load %arg5[%c0_9, %c0_10] : memref<32x32xbf16, #tpu.memory_space<vmem>>, vector<32x32xbf16>
    %cst = arith.constant dense<0.000000e+00> : vector<8x32xf32>
    %9 = tpu.matmul %6, %8, %cst {dimension_numbers = #tpu.dot_dimension_numbers<[1], [0], [0], [1], [0, 0, 1, 1], [], []>} : vector<8x32xbf16>, vector<32x32xbf16>, vector<8x32xf32> -> vector<8x32xf32>
    %c0_11 = arith.constant 0 : index
    %c0_12 = arith.constant 0 : index
    %10 = vector.load %arg6[%c0_11, %c0_12] : memref<1x32xf32, #tpu.memory_space<vmem>>, vector<1x32xf32>
    %11 = vector.broadcast %10 : vector<1x32xf32> to vector<8x32xf32>
    %12 = arith.addf %9, %11 : vector<8x32xf32>
    %c0_13 = arith.constant 0 : index
    %c0_14 = arith.constant 0 : index
    %13 = vector.load %arg7[%c0_13, %c0_14] : memref<32x32xbf16, #tpu.memory_space<vmem>>, vector<32x32xbf16>
    %cst_15 = arith.constant dense<0.000000e+00> : vector<8x32xf32>
    %14 = tpu.matmul %7, %13, %cst_15 {dimension_numbers = #tpu.dot_dimension_numbers<[1], [0], [0], [1], [0, 0, 1, 1], [], []>} : vector<8x32xbf16>, vector<32x32xbf16>, vector<8x32xf32> -> vector<8x32xf32>
    %c0_16 = arith.constant 0 : index
    %c0_17 = arith.constant 0 : index
    %15 = vector.load %arg8[%c0_16, %c0_17] : memref<1x32xf32, #tpu.memory_space<vmem>>, vector<1x32xf32>
    %16 = vector.broadcast %15 : vector<1x32xf32> to vector<8x32xf32>
    %17 = arith.addf %14, %16 : vector<8x32xf32>
    %c0_18 = arith.constant 0 : index
    %c0_19 = arith.constant 0 : index
    %18 = vector.load %arg9[%c0_18, %c0_19] : memref<32x32xbf16, #tpu.memory_space<vmem>>, vector<32x32xbf16>
    %cst_20 = arith.constant dense<0.000000e+00> : vector<8x32xf32>
    %19 = tpu.matmul %7, %18, %cst_20 {dimension_numbers = #tpu.dot_dimension_numbers<[1], [0], [0], [1], [0, 0, 1, 1], [], []>} : vector<8x32xbf16>, vector<32x32xbf16>, vector<8x32xf32> -> vector<8x32xf32>
    %c0_21 = arith.constant 0 : index
    %c0_22 = arith.constant 0 : index
    %20 = vector.load %arg10[%c0_21, %c0_22] : memref<1x32xf32, #tpu.memory_space<vmem>>, vector<1x32xf32>
    %21 = vector.broadcast %20 : vector<1x32xf32> to vector<8x32xf32>
    %22 = arith.addf %19, %21 : vector<8x32xf32>
    %23 = arith.truncf %12 : vector<8x32xf32> to vector<8x32xbf16>
    %24 = vector.shape_cast %23 : vector<8x32xbf16> to vector<8x4x8xbf16>
    %25 = arith.truncf %17 : vector<8x32xf32> to vector<8x32xbf16>
    %26 = vector.shape_cast %25 : vector<8x32xbf16> to vector<8x4x8xbf16>
    %27 = arith.truncf %22 : vector<8x32xf32> to vector<8x32xbf16>
    %28 = vector.shape_cast %27 : vector<8x32xbf16> to vector<8x4x8xbf16>
    "tpu.trace_start"() <{level = 10 : i32, message = "qhd,khd->hqk"}> : () -> ()
    %cst_23 = arith.constant dense<0.000000e+00> : vector<4x8x8xf32>
    %29 = tpu.matmul %24, %26, %cst_23 {dimension_numbers = #tpu.dot_dimension_numbers<[2], [2], [0], [0], [0, 1, 0, 0, 1, 0], [1], [1]>} : vector<8x4x8xbf16>, vector<8x4x8xbf16>, vector<4x8x8xf32> -> vector<4x8x8xf32>
    "tpu.trace_stop"() : () -> ()
    %cst_24 = arith.constant 0.353553385 : f32
    %30 = vector.broadcast %cst_24 : f32 to vector<4x8x8xf32>
    %31 = arith.mulf %29, %30 : vector<4x8x8xf32>
    %32 = vector.shape_cast %5 : vector<1x8xf32> to vector<1x1x8xf32>
    %33 = vector.broadcast %32 : vector<1x1x8xf32> to vector<4x8x8xf32>
    %34 = arith.addf %31, %33 : vector<4x8x8xf32>
    %cst_25 = arith.constant dense<0xFF800000> : vector<4x8xf32>
    %35 = vector.multi_reduction <maximumf>, %34, %cst_25 [2] : vector<4x8x8xf32> to vector<4x8xf32>
    %36 = vector.shape_cast %35 : vector<4x8xf32> to vector<4x8x1xf32>
    %37 = vector.broadcast %36 : vector<4x8x1xf32> to vector<4x8x8xf32>
    %38 = arith.subf %34, %37 : vector<4x8x8xf32>
    %39 = math.exp %38 : vector<4x8x8xf32>
    %cst_26 = arith.constant dense<0.000000e+00> : vector<4x8xf32>
    %40 = vector.multi_reduction <add>, %39, %cst_26 [2] : vector<4x8x8xf32> to vector<4x8xf32>
    %41 = vector.shape_cast %40 : vector<4x8xf32> to vector<4x8x1xf32>
    %42 = tpu.reciprocal %41 {approx = true} : vector<4x8x1xf32> -> vector<4x8x1xf32>
    %43 = vector.broadcast %42 : vector<4x8x1xf32> to vector<4x8x8xf32>
    %44 = arith.mulf %39, %43 : vector<4x8x8xf32>
    %45 = arith.truncf %44 : vector<4x8x8xf32> to vector<4x8x8xbf16>
    "tpu.trace_start"() <{level = 10 : i32, message = "hqk,khd->qhd"}> : () -> ()
    %cst_27 = arith.constant dense<0.000000e+00> : vector<4x8x8xf32>
    %46 = tpu.matmul %28, %45, %cst_27 {dimension_numbers = #tpu.dot_dimension_numbers<[0], [2], [2], [1], [0, 1, 0, 2, 1, 1], [1], [0]>} : vector<8x4x8xbf16>, vector<4x8x8xbf16>, vector<4x8x8xf32> -> vector<4x8x8xf32>
    %47 = tpu.transpose %46, [2, 0, 1] : vector<4x8x8xf32> -> vector<8x4x8xf32>
    "tpu.trace_stop"() : () -> ()
    %48 = vector.shape_cast %47 : vector<8x4x8xf32> to vector<8x32xf32>
    %49 = arith.truncf %48 : vector<8x32xf32> to vector<8x32xbf16>
    %c0_28 = arith.constant 0 : index
    %c0_29 = arith.constant 0 : index
    %50 = vector.load %arg11[%c0_28, %c0_29] : memref<32x32xbf16, #tpu.memory_space<vmem>>, vector<32x32xbf16>
    %cst_30 = arith.constant dense<0.000000e+00> : vector<8x32xf32>
    %51 = tpu.matmul %49, %50, %cst_30 {dimension_numbers = #tpu.dot_dimension_numbers<[1], [0], [0], [1], [0, 0, 1, 1], [], []>} : vector<8x32xbf16>, vector<32x32xbf16>, vector<8x32xf32> -> vector<8x32xf32>
    %c0_31 = arith.constant 0 : index
    %c0_32 = arith.constant 0 : index
    %52 = vector.load %arg12[%c0_31, %c0_32] : memref<1x32xf32, #tpu.memory_space<vmem>>, vector<1x32xf32>
    %53 = vector.broadcast %52 : vector<1x32xf32> to vector<8x32xf32>
    %54 = arith.addf %51, %53 : vector<8x32xf32>
    %55 = arith.addf %54, %1 : vector<8x32xf32>
    %cst_33 = arith.constant dense<0.000000e+00> : vector<8xf32>
    %56 = vector.multi_reduction <add>, %55, %cst_33 [1] : vector<8x32xf32> to vector<8xf32>
    %57 = vector.shape_cast %56 : vector<8xf32> to vector<8x1xf32>
    %cst_34 = arith.constant 3.200000e+01 : f32
    %58 = vector.broadcast %cst_34 : f32 to vector<8x1xf32>
    %59 = arith.divf %57, %58 : vector<8x1xf32>
    %60 = vector.broadcast %59 : vector<8x1xf32> to vector<8x32xf32>
    %61 = arith.subf %55, %60 : vector<8x32xf32>
    %62 = arith.mulf %61, %61 : vector<8x32xf32>
    %cst_35 = arith.constant dense<0.000000e+00> : vector<8xf32>
    %63 = vector.multi_reduction <add>, %62, %cst_35 [1] : vector<8x32xf32> to vector<8xf32>
    %64 = vector.shape_cast %63 : vector<8xf32> to vector<8x1xf32>
    %cst_36 = arith.constant 3.200000e+01 : f32
    %65 = vector.broadcast %cst_36 : f32 to vector<8x1xf32>
    %66 = arith.divf %64, %65 : vector<8x1xf32>
    %67 = vector.broadcast %59 : vector<8x1xf32> to vector<8x32xf32>
    %68 = arith.subf %55, %67 : vector<8x32xf32>
    %cst_37 = arith.constant 9.99999996E-13 : f32
    %69 = vector.broadcast %cst_37 : f32 to vector<8x1xf32>
    %70 = arith.addf %66, %69 : vector<8x1xf32>
    %71 = math.rsqrt %70 : vector<8x1xf32>
    %72 = vector.broadcast %71 : vector<8x1xf32> to vector<8x32xf32>
    %73 = arith.mulf %68, %72 : vector<8x32xf32>
    %c0_38 = arith.constant 0 : index
    %c0_39 = arith.constant 0 : index
    %74 = vector.load %arg13[%c0_38, %c0_39] : memref<1x32xf32, #tpu.memory_space<vmem>>, vector<1x32xf32>
    %75 = vector.broadcast %74 : vector<1x32xf32> to vector<8x32xf32>
    %76 = arith.mulf %75, %73 : vector<8x32xf32>
    %c0_40 = arith.constant 0 : index
    %c0_41 = arith.constant 0 : index
    %77 = vector.load %arg14[%c0_40, %c0_41] : memref<1x32xf32, #tpu.memory_space<vmem>>, vector<1x32xf32>
    %78 = vector.broadcast %77 : vector<1x32xf32> to vector<8x32xf32>
    %79 = arith.addf %76, %78 : vector<8x32xf32>
    %c0_42 = arith.constant 0 : index
    %c0_43 = arith.constant 0 : index
    %c0_44 = arith.constant 0 : index
    %80 = vector.load %arg15[%c0_42, %c0_43, %c0_44] : memref<1x8x32xf32, #tpu.memory_space<vmem>>, vector<1x8x32xf32>
    %81 = vector.shape_cast %80 : vector<1x8x32xf32> to vector<8x32xf32>
    %82 = vector.shape_cast %79 : vector<8x32xf32> to vector<1x8x32xf32>
    tpu.vector_store %arg15[%c0_42, %c0_43, %c0_44], %82 {strides = array<i32>} : memref<1x8x32xf32, #tpu.memory_space<vmem>>, vector<1x8x32xf32>,
    return
  }
  func.func @transform_0(%arg0: i32, %arg1: i32) -> (i32, i32, i32) {
    %c0_i32 = arith.constant 0 : i32
    %c0_i32_0 = arith.constant 0 : i32
    return %arg0, %arg1, %c0_i32 : i32, i32, i32
  }
  func.func @transform_1(%arg0: i32, %arg1: i32) -> (i32, i32, i32) {
    %c0_i32 = arith.constant 0 : i32
    %c0_i32_0 = arith.constant 0 : i32
    %c0_i32_1 = arith.constant 0 : i32
    return %arg0, %c0_i32, %c0_i32_0 : i32, i32, i32
  }
  func.func @transform_2(%arg0: i32, %arg1: i32) -> (i32, i32, i32, i32) {
    %c0_i32 = arith.constant 0 : i32
    %c0_i32_0 = arith.constant 0 : i32
    %c0_i32_1 = arith.constant 0 : i32
    %c0_i32_2 = arith.constant 0 : i32
    return %arg0, %c0_i32, %c0_i32_0, %c0_i32_1 : i32, i32, i32, i32
  }
  func.func @transform_3(%arg0: i32, %arg1: i32) -> (i32, i32) {
    %c0_i32 = arith.constant 0 : i32
    %c0_i32_0 = arith.constant 0 : i32
    %c0_i32_1 = arith.constant 0 : i32
    return %c0_i32, %c0_i32_0 : i32, i32
  }
  func.func @transform_4(%arg0: i32, %arg1: i32) -> (i32, i32) {
    %c0_i32 = arith.constant 0 : i32
    %c0_i32_0 = arith.constant 0 : i32
    %c0_i32_1 = arith.constant 0 : i32
    return %c0_i32, %c0_i32_0 : i32, i32
  }
  func.func @transform_5(%arg0: i32, %arg1: i32) -> (i32, i32) {
    %c0_i32 = arith.constant 0 : i32
    %c0_i32_0 = arith.constant 0 : i32
    %c0_i32_1 = arith.constant 0 : i32
    return %c0_i32, %c0_i32_0 : i32, i32
  }
  func.func @transform_6(%arg0: i32, %arg1: i32) -> (i32, i32) {
    %c0_i32 = arith.constant 0 : i32
    %c0_i32_0 = arith.constant 0 : i32
    %c0_i32_1 = arith.constant 0 : i32
    return %c0_i32, %c0_i32_0 : i32, i32
  }
  func.func @transform_7(%arg0: i32, %arg1: i32) -> (i32, i32) {
    %c0_i32 = arith.constant 0 : i32
    %c0_i32_0 = arith.constant 0 : i32
    %c0_i32_1 = arith.constant 0 : i32
    return %c0_i32, %c0_i32_0 : i32, i32
  }
  func.func @transform_8(%arg0: i32, %arg1: i32) -> (i32, i32) {
    %c0_i32 = arith.constant 0 : i32
    %c0_i32_0 = arith.constant 0 : i32
    %c0_i32_1 = arith.constant 0 : i32
    return %c0_i32, %c0_i32_0 : i32, i32
  }
  func.func @transform_9(%arg0: i32, %arg1: i32) -> (i32, i32) {
    %c0_i32 = arith.constant 0 : i32
    %c0_i32_0 = arith.constant 0 : i32
    %c0_i32_1 = arith.constant 0 : i32
    return %c0_i32, %c0_i32_0 : i32, i32
  }
  func.func @transform_10(%arg0: i32, %arg1: i32) -> (i32, i32) {
    %c0_i32 = arith.constant 0 : i32
    %c0_i32_0 = arith.constant 0 : i32
    %c0_i32_1 = arith.constant 0 : i32
    return %c0_i32, %c0_i32_0 : i32, i32
  }
  func.func @transform_11(%arg0: i32, %arg1: i32) -> (i32, i32) {
    %c0_i32 = arith.constant 0 : i32
    %c0_i32_0 = arith.constant 0 : i32
    %c0_i32_1 = arith.constant 0 : i32
    return %c0_i32, %c0_i32_0 : i32, i32
  }
  func.func @transform_12(%arg0: i32, %arg1: i32) -> (i32, i32) {
    %c0_i32 = arith.constant 0 : i32
    %c0_i32_0 = arith.constant 0 : i32
    %c0_i32_1 = arith.constant 0 : i32
    return %c0_i32, %c0_i32_0 : i32, i32
  }
  func.func @transform_13(%arg0: i32, %arg1: i32) -> (i32, i32, i32) {
    %c0_i32 = arith.constant 0 : i32
    %c0_i32_0 = arith.constant 0 : i32
    return %arg0, %arg1, %c0_i32 : i32, i32, i32
  }
}

</mosaic_0001>

<bundles_post_ra>
// kernel: tpu_custom_call.1
= control target key start
LH: loop header
LB: loop body
LE: loop exit
PB: predicated region body
PF: predicated region fallthrough
CT: control target
= control target key end

     0   :  { %s3116_s0 = inlined_call_operand.hbm [shape: f32[2,8,32], index: 0, kind: input, shape index: {}]   ;;  %s3117_s1 = inlined_call_operand.hbm [shape: f32[2,8,32], index: 1, kind: input, shape index: {}]   ;;  %s3118_s2 = inlined_call_operand.hbm [shape: f32[2,1,1,8], index: 2, kind: input, shape index: {}]   ;;  %s3119_s3 = inlined_call_operand.hbm [shape: bf16[32,32], index: 3, kind: input, shape index: {}]   ;;  %s3120_s4 = inlined_call_operand.hbm [shape: f32[1,32], index: 4, kind: input, shape index: {}]   ;;  %s3121_s5 = inlined_call_operand.hbm [shape: bf16[32,32], index: 5, kind: input, shape index: {}]   ;;  %s3122_s6 = inlined_call_operand.hbm [shape: f32[1,32], index: 6, kind: input, shape index: {}]   ;;  %s3123_s7 = inlined_call_operand.hbm [shape: bf16[32,32], index: 7, kind: input, shape index: {}]   ;;  %s3124_s8 = inlined_call_operand.hbm [shape: f32[1,32], index: 8, kind: input, shape index: {}]   ;;  %s3125_s9 = inlined_call_operand.vmem [shape: bf16[32,32], index: 9, kind: input, shape index: {}]   ;;  %s3126_s10 = inlined_call_operand.vmem [shape: f32[1,32], index: 10, kind: input, shape index: {}]   ;;  %s3127_s11 = inlined_call_operand.vmem [shape: f32[1,32], index: 11, kind: input, shape index: {}]   ;;  %s3128_s12 = inlined_call_operand.vmem [shape: f32[1,32], index: 12, kind: input, shape index: {}]   ;;  %s3129_s13 = inlined_call_operand.hbm [shape: f32[2,8,32], index: 13, kind: output, shape index: {}]  }
   0x1   :  { %3146 = sst [smem:[#allocation32_spill]] %s3119_s3 }
   0x2   :  { %3147 = sst [smem:[#allocation33_spill]] %s3121_s5 }
   0x3   :  { %3148 = sst [smem:[#allocation34_spill]] %s3123_s7 }
   0x4   :  { %3149 = sst [smem:[#allocation35_spill]] %s3127_s11 }
   0x5   :  { %3150 = sst [smem:[#allocation36_spill]] %s3128_s12 }
   0x6   :  { %3151 = sst [smem:[#allocation37_spill]] %s3129_s13 }
   0x7   :  { %18 = vsyncpa [#allocation3], 0 }
   0x8   :  { %20 = vsyncpa [#allocation3 + $0x1], 0 }
   0x9   :  { %21 = vsyncpa [#allocation6], 0 }
   0xa   :  { %23 = vsyncpa [#allocation6 + $0x1], 0 }
   0xb   :  { %24 = vsyncpa [#allocation9], 0 }
   0xc   :  { %25 = vsyncpa [#allocation12], 0 }
   0xd   :  { %26 = vsyncpa [#allocation15], 0 }
   0xe   :  { %27 = vsyncpa [#allocation4], 0 }
   0xf   :  { %29 = vsyncpa [#allocation4 + $0x1], 0  ;;  %s2754_s25 = smov 0   ;;  %s2756_s26 = smov 0  }
  0x10   :  { %s2758_s27 = smov 0   ;;  %s2760_s28 = smov 0  }
  0x11   :  { %s2762_s29 = smov 0   ;;  %s2764_s30 = smov 0  }
  0x12 LB: > { %3152 = sst [smem:[#allocation24_spill]] %s2640_s25  ;;  %s2785_s14 = sadd.s32 4294967295, %s2660_s30   ;;  %s2660_s30 = sphi %s2764_s30, %s35_s30   ;;  %s2656_s29 = sphi %s2762_s29, %s3201_s29   ;;  %s2652_s28 = sphi %s2760_s28, %s3200_s28   ;;  %s2648_s27 = sphi %s2758_s27, %s3196_s27   ;;  %s2644_s26 = sphi %s2756_s26, %s3199_s26   ;;  %s2640_s25 = sphi %s2754_s25, %s3198_s25  }
  0x13   : > { %3153 = sst [smem:[#allocation25_spill]] %s2648_s27  ;;  %p1988_p0 = scmp.ge.s32.totalorder %s2660_s30, 1 }
  0x14   : > { %3154 = sst [smem:[#allocation26_spill]] %s2652_s28  ;;  %p3131_p1 = scmp.eq.s32.totalorder %s2785_s14, 0 }
  0x15   : > { %3155 = sst [smem:[#allocation27_spill]] %s2660_s30  ;;  %p370_p2 = scmp.lt.s32.totalorder %s2660_s30, 3 }
  0x16   : > { %s2662_s16 = smov [#allocation8]   ;;  %s2663_s19 = smov [#allocation11]  }
  0x17   : > { %p2790_p3 = pnand %p1988_p0, %p370_p2  ;;  %s382_s17 = sshll.u32 %s2662_s16, 4  ;;  %s383_s17 = int_to_ptr.vmem [resolvable:$true] %s382_s17 }
  0x18   : > { %s406_s20 = sshll.u32 %s2663_s19, 4  ;;  %s2664_s21 = smov [#allocation14]   ;;  %s407_s20 = int_to_ptr.vmem [resolvable:$true] %s406_s20 }
  0x19   : > { %s3156_s15 = scalar_select %p2790_p3, 1, 0 }
  0x1a   : > { %p2184_p4 = pneg %p2790_p3  ;;  %s430_s22 = sshll.u32 %s2664_s21, 4  ;;  %s431_s22 = int_to_ptr.vmem [resolvable:$true] %s430_s22 }
  0x1b   : > { %s2335_s24 = scalar_lea.vmem %s383_s17, 256  ;;  %p2343_p11 = scmp.lt.s32.totalorder %s383_s17, %s383_s17 }
  0x1c   : > { %p2799_p6 = pnand %p2184_p4, %p3131_p1  ;;  %p2336_p8 = scmp.ne.s32.totalorder %s383_s17, %s2335_s24 }
  0x1d   : > { %p2344_p12 = scmp.lt.s32.totalorder %s2335_s24, %s2335_s24 }
  0x1e   : > { %s3157_s18 = scalar_select %p2799_p6, 1, 0 }
  0x1f   : > { %p2805_p7 = pneg %p2799_p6  ;;  %p2345_p13 = por %p2344_p12, %p2343_p11 }
  0x21   : > { %p2338_p9 = pnand %p2336_p8, %p2805_p7 }
  0x23   : > { %p2339_p10 = pneg %p2338_p9 }
  0x25   : > { %p2346_p0 = pnand %p2345_p13, %p2339_p10 }
  0x27   : > { %2349 = shalt.err (!%p2346_p0)
}
  0x28   : > { %s2665_s16 = smov 64   ;;  %s2666_s19 = smov 4  }
  0x29   : > { %s3159_s3 = sld [smem:[#allocation32_spill]]  ;;  %s2361_s12 = scalar_lea.vmem %s407_s20, 256 }
  0x2a   : > { %p2362_p2 = scmp.ne.s32.totalorder %s407_s20, %s2361_s12  ;;  %p2369_p9 = scmp.lt.s32.totalorder %s407_s20, %s407_s20 }
  0x2b   : > { %p2370_p5 = scmp.lt.s32.totalorder %s2361_s12, %s2361_s12 }
  0x2c   : > { %p2364_p4 = pnand %p2362_p2, %p2805_p7 }
  0x2d   : > { %p2371_p1 = por %p2370_p5, %p2369_p9 }
  0x2e   : > { %p2365_p8 = pneg %p2364_p4 }
  0x2f   : > { %2187 = dma.hbm_to_vmem [thread:$0]  (!%p2799_p6), %s3159_s3, 256, %s383_s17, [#allocation9], %s2665_s16, %s2665_s16, %s2666_s19  }
  0x30   : > { %p2372_p11 = pnand %p2371_p1, %p2365_p8 }
  0x32   : > { %2375 = shalt.err (!%p2372_p11)
}
  0x33   : > { %s3160_s5 = sld [smem:[#allocation33_spill]]  ;;  %s2387_s13 = scalar_lea.vmem %s431_s22, 256 }
  0x34   : > { %p2388_p10 = scmp.ne.s32.totalorder %s431_s22, %s2387_s13  ;;  %p2395_p0 = scmp.lt.s32.totalorder %s431_s22, %s431_s22 }
  0x35   : > { %p2396_p2 = scmp.lt.s32.totalorder %s2387_s13, %s2387_s13 }
  0x36   : > { %p2390_p12 = pnand %p2388_p10, %p2805_p7 }
  0x37   : > { %p2397_p4 = por %p2396_p2, %p2395_p0 }
  0x38   : > { %p2391_p13 = pneg %p2390_p12 }
  0x39   : > { %2193 = dma.hbm_to_vmem [thread:$0]  (!%p2799_p6), %s3160_s5, 256, %s407_s20, [#allocation12], %s2665_s16, %s2665_s16, %s2666_s19  }
  0x3a   : > { %p2398_p3 = pnand %p2397_p4, %p2391_p13 }
  0x3c   : > { %2401 = shalt.err (!%p2398_p3)
}
  0x3d   : > { %s3161_s7 = sld [smem:[#allocation34_spill]]  ;;  %s1987_s11 = sadd.s32 4294967294, %s2660_s30  }
  0x3e   : > { %s47_s20 = sadd.s32 1, %s2656_s29  ;;  %s56_s21 = sadd.s32 1, %s2648_s27 }
  0x3f   : > { %p49_p1 = scmp.ge.s32.totalorder %s47_s20, 2  ;;  %p63_p3 = scmp.ne.s32.totalorder %s2648_s27, %s2644_s26 }
  0x40   : > { %p64_p5 = scmp.eq.s32.totalorder %s2660_s30, 0  ;;  %p69_p8 = scmp.ne.s32.totalorder %s2644_s26, %s2640_s25 }
  0x41   : > { %s3203_s20 = smov (%p49_p1, %s47_s20), 0  ;;  %p3164_p11 = scmp.eq.s32.totalorder %s2785_s14, 0 }
  0x42   : > { %3162 = sst [smem:[#allocation28_spill]] %s3203_s20  ;;  %p2840_p9 = por %p64_p5, %p63_p3 }
  0x43   : > { %2199 = dma.hbm_to_vmem [thread:$0]  (!%p2799_p6), %s3161_s7, 256, %s431_s22, [#allocation15], %s2665_s16, %s2665_s16, %s2666_s19  }
  0x44   : > { %p2846_p10 = por %p3164_p11, %p69_p8  ;;  %s51_s16 = ssub.s32 %s2656_s29, %s3203_s20 }
  0x45   : > { %p357_p12 = scmp.eq.s32.totalorder %s2785_s14, 1  ;;  %p54_p13 = scmp.eq.s32.totalorder %s51_s16, 0 }
  0x46   : > { %s3165_s22 = scalar_select %p2846_p10, 1, 0 }
  0x47   : > { %p363_p0 = scmp.eq.s32.totalorder %s1987_s11, 1  ;;  %p2853_p2 = por %p357_p12, %p63_p3 }
  0x48   : > { %p2223_p4 = scmp.lt.s32.totalorder %s2660_s30, 2  ;;  %s2866_s17 = sand.u32 1, %s2648_s27  }
  0x49   : > { %s3166_s19 = scalar_select %p2853_p2, 1, 0 }
  0x4a   : > { %s2859_s13 = scalar_select %p54_p13, %s2648_s27, %s56_s21  }
  0x4b   : > { %3167 = sst [smem:[#allocation29_spill]] %s3166_s19  ;;  %p2861_p1 = por %p363_p0, %p69_p8 }
  0x4c   : > { %3168 = sst [smem:[#allocation30_spill]] %s2859_s13  ;;  %s1996_s3 = sshll.u32 %s2866_s17, 3 }
  0x4d   : > { %s3169_s12 = scalar_select %p2861_p1, 1, 0 }
  0x4e   : > { %s1997_s5 = sshll.u32 %s2656_s29, 7  ;;  %p2872_p5 = pnand %p2223_p4, %p2840_p9 }
  0x4f   : > { %3170 = sst [smem:[#allocation31_spill]] %s3169_s12  ;;  %s486_s16 = sand.u32 1, %s2660_s30  }
  0x50   : > { %s495_s20 = scalar_lea.hbm %s3117_s1, %s1997_s5  ;;  %s490_s13 = scalar_lea.vmem [#allocation5], %s1996_s3 }
  0x51   : > { %s497_s27 = sshll.u32 %s490_s13, 4  ;;  %s2667_s12 = smov [#allocation10]   ;;  %s498_s27 = int_to_ptr.vmem [resolvable:$true] %s497_s27 }
  0x52   : > { %s396_s25 = sshll.u32 %s2667_s12, 4  ;;  %s2884_s19 = scalar_lea.sflag [#allocation6], %s486_s16  ;;  %s397_s25 = int_to_ptr.vmem [resolvable:$true] %s396_s25 }
  0x53   : > { %p3141_p3 = pneg %p2872_p5  ;;  %s2415_s24 = scalar_lea.vmem %s498_s27, 128 }
  0x54   : > { %p2416_p8 = scmp.ne.s32.totalorder %s498_s27, %s2415_s24  ;;  %s2668_s30 = smov [#allocation5]  }
  0x55   : > { %s2420_s28 = sshll.u32 %s2668_s30, 4  ;;  %s2421_s28 = int_to_ptr.vmem [resolvable:$false] %s2420_s28 }
  0x56   : > { %p2418_p9 = pnand %p2416_p8, %p3141_p3  ;;  %s2422_s7 = scalar_lea.vmem %s2421_s28, 256 }
  0x57   : > { %p2423_p12 = scmp.lt.s32.totalorder %s498_s27, %s2421_s28  ;;  %p2424_p13 = scmp.lt.s32.totalorder %s2422_s7, %s2415_s24 }
  0x58   : > { %p2419_p11 = pneg %p2418_p9 }
  0x59   : > { %p2425_p0 = por %p2424_p13, %p2423_p12 }
  0x5b   : > { %p2426_p4 = pnand %p2425_p0, %p2419_p11 }
  0x5d   : > { %2429 = shalt.err (!%p2426_p4)
}
  0x5e   : > { %2209 = dma.hbm_to_vmem [thread:$0]  (!%p2872_p5), %s495_s20, 128, %s498_s27, %s2884_s19  }
  0x5f   : > { %s2441_s13 = scalar_lea.vmem %s397_s25, 16  ;;  %s2448_s12 = scalar_lea.vmem %s397_s25, 32 }
  0x60   : > { %p2442_p1 = scmp.ne.s32.totalorder %s397_s25, %s2441_s13  ;;  %p2449_p3 = scmp.lt.s32.totalorder %s397_s25, %s397_s25 }
  0x61   : > { %p2450_p2 = scmp.lt.s32.totalorder %s2448_s12, %s2441_s13 }
  0x62   : > { %p2444_p8 = pnand %p2442_p1, %p2805_p7 }
  0x63   : > { %p2451_p10 = por %p2450_p2, %p2449_p3 }
  0x64   : > { %p2445_p9 = pneg %p2444_p8 }
  0x66   : > { %p2452_p6 = pnand %p2451_p10, %p2445_p9 }
  0x68   : > { %2455 = shalt.err (!%p2452_p6)
}
  0x69   : > { %p3172_p11 = scmp.ne.s32.totalorder %s3157_s18, 0  ;;  %s2669_s27 = smov [#allocation13]  }
  0x6a   : > { %s420_s20 = sshll.u32 %s2669_s27, 4  ;;  %s2670_s16 = smov [#allocation16]   ;;  %s421_s20 = int_to_ptr.vmem [resolvable:$true] %s420_s20 }
  0x6b   : > { %2190 = dma.hbm_to_vmem [thread:$0]  (!%p3172_p11), %s3120_s4, 16, %s397_s25, [#allocation9]  }
  0x6c   : > { %s444_s21 = sshll.u32 %s2670_s16, 4  ;;  %s2467_s24 = scalar_lea.vmem %s421_s20, 16  ;;  %s445_s21 = int_to_ptr.vmem [resolvable:$true] %s444_s21 }
  0x6d   : > { %p2468_p1 = scmp.ne.s32.totalorder %s421_s20, %s2467_s24  ;;  %s2474_s7 = scalar_lea.vmem %s421_s20, 32 }
  0x6e   : > { %p2475_p10 = scmp.lt.s32.totalorder %s421_s20, %s421_s20  ;;  %p2476_p6 = scmp.lt.s32.totalorder %s2474_s7, %s2467_s24 }
  0x6f   : > { %p2470_p12 = pnand %p2468_p1, %p2805_p7 }
  0x70   : > { %p2477_p2 = por %p2476_p6, %p2475_p10 }
  0x71   : > { %p2471_p13 = pneg %p2470_p12 }
  0x73   : > { %p2478_p3 = pnand %p2477_p2, %p2471_p13 }
  0x75   : > { %2481 = shalt.err (!%p2478_p3)
}
  0x76   : > { %2196 = dma.hbm_to_vmem [thread:$0]  (!%p3172_p11), %s3122_s6, 16, %s421_s20, [#allocation12]  }
  0x77   : > { %s2493_s12 = scalar_lea.vmem %s445_s21, 16  ;;  %s2500_s28 = scalar_lea.vmem %s445_s21, 32 }
  0x78   : > { %p2494_p0 = scmp.ne.s32.totalorder %s445_s21, %s2493_s12  ;;  %p2501_p9 = scmp.lt.s32.totalorder %s445_s21, %s445_s21 }
  0x79   : > { %p2502_p1 = scmp.lt.s32.totalorder %s2500_s28, %s2493_s12 }
  0x7a   : > { %p2496_p4 = pnand %p2494_p0, %p2805_p7 }
  0x7b   : > { %p2503_p12 = por %p2502_p1, %p2501_p9 }
  0x7c   : > { %p2497_p8 = pneg %p2496_p4 }
  0x7e   : > { %p2504_p10 = pnand %p2503_p12, %p2497_p8 }
  0x80   : > { %2507 = shalt.err (!%p2504_p10)
}
  0x81   : > { %2202 = dma.hbm_to_vmem [thread:$0]  (!%p3172_p11), %s3124_s8, 16, %s445_s21, [#allocation15]  }
  0x82   : > { %s477_s16 = scalar_lea.hbm %s3116_s0, %s1997_s5  ;;  %s471_s24 = scalar_lea.vmem [#allocation2], %s1996_s3 }
  0x83   : > { %s479_s7 = sshll.u32 %s471_s24, 4  ;;  %s2000_s13 = sshll.u32 %s2656_s29, 4  ;;  %s480_s7 = int_to_ptr.vmem [resolvable:$true] %s479_s7 }
  0x84   : > { %s468_s18 = scalar_lea.sflag [#allocation3], %s2866_s17  ;;  %s2521_s25 = scalar_lea.vmem %s480_s7, 128 }
  0x85   : > { %p2522_p7 = scmp.ne.s32.totalorder %s480_s7, %s2521_s25  ;;  %p3173_p13 = pneg %p2872_p5 }
  0x86   : > { %s2671_s12 = smov [#allocation2]  }
  0x87   : > { %p2524_p6 = pnand %p2522_p7, %p3173_p13  ;;  %s2526_s28 = sshll.u32 %s2671_s12, 4  ;;  %s2527_s28 = int_to_ptr.vmem [resolvable:$false] %s2526_s28 }
  0x88   : > { %s2528_s21 = scalar_lea.vmem %s2527_s28, 256  ;;  %p2529_p11 = scmp.lt.s32.totalorder %s480_s7, %s2527_s28 }
  0x89   : > { %p2525_p2 = pneg %p2524_p6  ;;  %p2530_p3 = scmp.lt.s32.totalorder %s2528_s21, %s2521_s25 }
  0x8b   : > { %p2531_p0 = por %p2530_p3, %p2529_p11 }
  0x8d   : > { %p2532_p4 = pnand %p2531_p0, %p2525_p2 }
  0x8f   : > { %2535 = shalt.err (!%p2532_p4)
}
  0x90   : > { %2206 = dma.hbm_to_vmem [thread:$0]  (!%p2872_p5), %s477_s16, 128, %s480_s7, %s468_s18  }
  0x91   : > { %s512_s30 = scalar_lea.hbm %s3118_s2, %s2000_s13  ;;  %s507_s27 = scalar_lea.vmem [#allocation7], %s2866_s17 }
  0x92   : > { %s514_s23 = sshll.u32 %s507_s27, 4  ;;  %p3174_p9 = pmov %p3173_p13  ;;  %s515_s23 = int_to_ptr.vmem [resolvable:$true] %s514_s23 }
  0x93   : > { %s2549_s20 = scalar_lea.vmem %s515_s23, 16  ;;  %s2672_s24 = smov [#allocation7]  }
  0x94   : > { %p2550_p8 = scmp.ne.s32.totalorder %s515_s23, %s2549_s20  ;;  %s2554_s25 = sshll.u32 %s2672_s24, 4  ;;  %s2555_s25 = int_to_ptr.vmem [resolvable:$false] %s2554_s25 }
  0x95   : > { %s2556_s12 = scalar_lea.vmem %s2555_s25, 32  ;;  %p2557_p10 = scmp.lt.s32.totalorder %s515_s23, %s2555_s25 }
  0x96   : > { %p2552_p1 = pnand %p2550_p8, %p3174_p9  ;;  %p2558_p7 = scmp.lt.s32.totalorder %s2556_s12, %s2549_s20 }
  0x98   : > { %p2553_p12 = pneg %p2552_p1  ;;  %p2559_p13 = por %p2558_p7, %p2557_p10 }
  0x9a   : > { %p2560_p6 = pnand %p2559_p13, %p2553_p12 }
  0x9c   : > { %2563 = shalt.err (!%p2560_p6)
}
  0x9d   : > { %2212 = dma.hbm_to_vmem [thread:$0]  (!%p2872_p5), %s512_s30, 16, %s515_s23, %s2884_s19  }
  0x9e   : > { %p3175_p2 = scmp.ne.s32.totalorder %s3156_s15, 0 }
  0x9f   : > { %s2942_s17 = sand.u32 (!%p3175_p2), 1, %s2644_s26   ;;  %p3176_p11 = scmp.ne.s32.totalorder (!%p3175_p2), %s3165_s22, 0 }
  0xa0   : > { %523 = sbr.rel (%p3175_p2) target bundleno = 2188 (0x88c), region = 72  ;;  %s2945_s16 = sshll.u32 (!%p3175_p2), %s2942_s17, 3 }
  0xa1   : > { %s526_s7 = scalar_lea.sflag (!%p3175_p2), [#allocation3], %s2942_s17  ;;  %s529_s13 = scalar_lea.vmem (!%p3175_p2), [#allocation2], %s2945_s16 }
  0xa5   : > { %2615 = dma.done.wait (%p3176_p11), %s526_s7, 128  }
  0xa6   : > { %2617 = vsyncadd (%p3176_p11), %s526_s7, 4294967168  ;;  %s534_s15 = sand.u32 1, %s2785_s14   ;;  %s538_s11 = scalar_lea.vmem [#allocation5], %s2945_s16 }
  0xa7   : > { %s535_s19 = scalar_lea.sflag [#allocation6], %s534_s15 }
  0xa8   : > { %2619 = dma.done.wait (%p3176_p11), %s535_s19, 144  }
  0xa9   : > { %2621 = vsyncadd (%p3176_p11), %s535_s19, 4294967152  ;;  %s546_s18 = scalar_lea.vmem [#allocation7], %s2942_s17  ;;  %p3177_p5 = scmp.eq.s32.totalorder %s2785_s14, 0 }
  0xab   : > { %2623 = dma.done.wait (%p3177_p5), [#allocation9], 272   ;;  %p3178_p3 = pmov %p3177_p5 }
  0xad   : > { %2625 = vsyncadd (%p3178_p3), [#allocation9], 4294967024  ;;  %p3179_p0 = pmov %p3178_p3 }
  0xaf   : > { %2627 = dma.done.wait (%p3179_p0), [#allocation12], 272   ;;  %p3180_p4 = pmov %p3179_p0 }
  0xb0   : > { %p3181_p8 = pmov %p3179_p0 }
  0xb1   : > { %2629 = vsyncadd (%p3180_p4), [#allocation12], 4294967024 }
  0xb2   : > { %2631 = dma.done.wait (%p3181_p8), [#allocation15], 272   ;;  %p3182_p9 = pmov %p3179_p0 }
  0xb3   : > { %v2673_v0 = vmov 0.0   ;;  %vm2674_vm0 = vmmov 0   ;;  %v2298_v1 = vld [vmem:[#allocation11 + $0x8] sm:$0xff]   ;;  %v2299_v2 = vld [vmem:[#allocation11] sm:$0xff]   ;;  %v2300_v4 = vld [vmem:[#allocation8 + $0x8] sm:$0xff]   ;;  %vm651_vm1 = vcmask 261120  }
  0xb4   : > { %2633 = vsyncadd (%p3182_p9), [#allocation15], 4294967024  ;;  %2080 = vmatprep.subr.bf16.mxu1 %v2673_v0  ;;  %2084 = vmatprep.mubr.msk.bf16.mxu1 %vm2674_vm0, %v2673_v0  ;;  %v624_v3 = vld [vmem:[%s538_s11] sm:$0xff]  ;;  %v2301_v5 = vld [vmem:[#allocation8] sm:$0xff]   ;;  %s2675_s14 = smov 104   ;;  %s2676_s22 = smov 120  }
  0xb5   : > { %2072 = vmatprep.subr.bf16.mxu0 %v2673_v0  ;;  %2076 = vmatprep.mubr.msk.bf16.mxu0 %vm2674_vm0, %v2673_v0  ;;  %v2979_v6 = vld [vmem:[%s529_s13] sm:$0xff]  ;;  %v627_v7 = vpack.c.bf16 %v624_v3, %v624_v3  ;;  %v2011_v12 = vld [vmem:[#allocation10] ss:$0 sm:$0xff]  ;;  %s2677_s28 = smov 112   ;;  %vm922_vm2 = vcmask 1043456   ;;  %vm918_vm3 = vcmask 64512  }
  0xb6   : > { %2081 = vmatpush3.bf16.msra.mxu1 %v2298_v1  ;;  %2073 = vmatpush3.bf16.msra.mxu0 %v2300_v4  ;;  %v626_v8 = vpack.c.bf16 %v2979_v6, %v2979_v6  ;;  %v2015_v9 = vld [vmem:[#allocation13] ss:$0 sm:$0xff]  ;;  %v2302_v23 = vld [vmem:[#allocation14 + $0x8] sm:$0xff]   ;;  %v2303_v24 = vld [vmem:[#allocation14] sm:$0xff]   ;;  %s2680_s27 = smov 16   ;;  %s2681_s23 = smov 8  }
  0xb7   : > { %2082 = vmatprep.subr.bf16.mxu1 %v2673_v0  ;;  %2074 = vmatprep.subr.bf16.mxu0 %v2673_v0  ;;  %v2027_v44 = vld [vmem:[%s546_s18] ss:$0 sm:$0xff]  ;;  %s2682_s20 = smov 24   ;;  %vm1691_vm4 = vcmask 130048   ;;  %vm1693_vm5 = vcmask 195584   ;;  %s3183_s12 = sld [smem:[#allocation26_spill]] }
  0xb8   : > { %s3184_s7 = sld [smem:[#allocation29_spill]]  ;;  %s2683_s25 = smov [#allocation17]  }
  0xb9   : > { %s3185_s19 = sld [smem:[#allocation35_spill]]  ;;  %s2568_s13 = sshll.u32 %s2683_s25, 4  ;;  %s2569_s13 = int_to_ptr.vmem [resolvable:$false] %s2568_s13 }
  0xba   : > { %2083 = vmatpush3.bf16.msra.mxu1 %v2299_v2  ;;  %2075 = vmatpush3.bf16.msra.mxu0 %v2301_v5  ;;  %s3187_s30 = sld [smem:[#allocation37_spill]] }
  0xbb   : > { %2096 = vmatprep.subr.bf16.mxu1 %v2673_v0  ;;  %2088 = vmatprep.subr.bf16.mxu0 %v2673_v0 }
  0xbd   : > { %2085 = vmatmul.mubr.msk.bf16.vlgmr.msra.gmra.mxu1 %vm651_vm1, %v627_v7  ;;  %2077 = vmatmul.mubr.msk.bf16.vlgmr.msra.gmra.mxu0 %vm651_vm1, %v626_v8 }
  0xbe   : > { %2098 = vmatprep.mubr.msk.bf16.mxu1 %vm2674_vm0, %v2673_v0  ;;  %2092 = vmatprep.mubr.msk.bf16.mxu0 %vm2674_vm0, %v2673_v0  ;;  %p3189_p12 = scmp.ne.s32.totalorder %s3184_s7, 0 }
  0xbf   : > { %2089 = vmatpush3.bf16.msra.mxu0 %v2302_v23 }
  0xc0   : > { %2090 = vmatprep.subr.bf16.mxu0 %v2673_v0 }
  0xc3   : > { %2091 = vmatpush3.bf16.msra.mxu0 %v2303_v24 }
  0xc4   : > { %2102 = vmatprep.subr.bf16.mxu0 %v2673_v0 }
  0xc6   : > { %2093 = vmatmul.mubr.msk.bf16.vlgmr.msra.gmra.mxu0 %vm651_vm1, %v627_v7 }
  0xc7   : > { %2104 = vmatprep.mubr.msk.bf16.mxu0 %vm2674_vm0, %v2673_v0 }
 0x17d   : > { %v755_v10 = vpop.f32.mrf.mxu1  ;;  %v689_v15 = vpop.f32.mrf.mxu0 }
 0x17e   : > { %v756_v11 = vadd.f32 %v2015_v9, %v755_v10  ;;  %v690_v17 = vadd.f32 %v2011_v12, %v689_v15  ;;  %v2019_v10 = vld [vmem:[#allocation16] ss:$0 sm:$0xff] }
 0x17f   : > { %v2086_v13 = vpop.f32.mrf.mxu1  ;;  %v2078_v18 = vpop.f32.mrf.mxu0 }
 0x180   : > { %v832_v14 = vpack.c.bf16 %v756_v11, %v756_v11  ;;  %v824_v20 = vpack.c.bf16 %v690_v17, %v690_v17 }
 0x181   : > { %v758_v16 = vpop.f32.mrf.mxu1  ;;  %v692_v21 = vpop.f32.mrf.mxu0 }
 0x182   : > { %840 = vrot.lane.b32.xlu1 %v832_v14, %s2675_s14  ;;  %834 = vrot.lane.b32.xlu0 %v832_v14, %s2676_s22 }
 0x183   : > { %v2087_v19 = vpop.f32.mrf.mxu1  ;;  %v2079_v22 = vpop.f32.mrf.mxu0 }
 0x186   : > { %837 = vrot.lane.b32.xlu0 %v832_v14, %s2677_s28  ;;  %826 = vrot.lane.b32.xlu1 %v824_v20, %s2676_s22  ;;  %v818_v35 = vpop.f32.mrf.mxu0 }
 0x187   : > { %v819_v11 = vadd.f32 %v2019_v10, %v818_v35 }
 0x188   : > { %v2094_v36 = vpop.f32.mrf.mxu0 }
 0x189   : > { %v843_v12 = vpack.c.bf16 %v819_v11, %v819_v11 }
 0x18a   : > { %828 = vrot.lane.b32.xlu0 %v824_v20, %s2677_s28  ;;  %830 = vrot.lane.b32.xlu1 %v824_v20, %s2675_s14  ;;  %v821_v39 = vpop.f32.mrf.mxu0 }
 0x18c   : > { %v2095_v40 = vpop.f32.mrf.mxu0 }
 0x1a8   : > { %854 = vxpose.xlu0.c.b16.start.end [1/1] (short) (narrow) %v832_v14, 16 }
 0x1f4   : > { %v835_v25 = vpop.permute.xlu0 %834  ;;  %v841_v27 = vpop.permute.xlu1 %840 }
 0x1f5   : > { %870 = vxpose.xlu1.c.b16.start.end [1/1] (short) (narrow) %v835_v25, 16 }
 0x1f8   : > { %v838_v26 = vpop.permute.xlu0 %837  ;;  %v827_v31 = vpop.permute.xlu1 %826 }
 0x1f9   : > { %886 = vxpose.xlu0.c.b16.start.end [1/1] (short) (narrow) %v838_v26, 16 }
 0x1fc   : > { %v829_v28 = vpop.permute.xlu0 %828  ;;  %v831_v32 = vpop.permute.xlu1 %830 }
 0x1fd   : > { %902 = vxpose.xlu0.c.b16.start.end [1/1] (short) (narrow) %v841_v27, 16 }
 0x20a   : > { %v862_v29 = vpop.trf.xlu0 }
 0x20b   : > { %v924_v30 = vsel %vm922_vm2, %v862_v29, 0 }
 0x20c   : > { %2097 = vmatpush3.bf16.msra.mxu1 %v924_v30 }
 0x20d   : > { %2108 = vmatprep.subr.bf16.mxu1 %v2673_v0 }
 0x20f   : > { %2099 = vmatmul.mubr.msk.bf16.vlgmr.msra.gmra.mxu1 %vm918_vm3, %v824_v20 }
 0x210   : > { %2110 = vmatprep.mubr.msk.bf16.mxu1 %vm2674_vm0, %v2673_v0 }
 0x257   : > { %v878_v33 = vpop.trf.xlu1 }
 0x258   : > { %v970_v34 = vsel %vm922_vm2, %v878_v33, 0 }
 0x259   : > { %2103 = vmatpush3.bf16.msra.mxu0 %v970_v34 }
 0x25a   : > { %2114 = vmatprep.subr.bf16.mxu0 %v2673_v0 }
 0x25b   : > { %v894_v37 = vpop.trf.xlu0 }
 0x25c   : > { %v1016_v38 = vsel %vm922_vm2, %v894_v37, 0  ;;  %2105 = vmatmul.mubr.msk.bf16.vlgmr.msra.gmra.mxu0 %vm918_vm3, %v827_v31 }
 0x25d   : > { %2109 = vmatpush3.bf16.msra.mxu1 %v1016_v38  ;;  %2116 = vmatprep.mubr.msk.bf16.mxu0 %vm2674_vm0, %v2673_v0 }
 0x25e   : > { %2120 = vmatprep.subr.bf16.mxu1 %v2673_v0 }
 0x25f   : > { %v910_v41 = vpop.trf.xlu0 }
 0x260   : > { %v1062_v42 = vsel %vm922_vm2, %v910_v41, 0  ;;  %2111 = vmatmul.mubr.msk.bf16.vlgmr.msra.gmra.mxu1 %vm918_vm3, %v829_v28 }
 0x261   : > { %2115 = vmatpush3.bf16.msra.mxu0 %v1062_v42  ;;  %2122 = vmatprep.mubr.msk.bf16.mxu1 %vm2674_vm0, %v2673_v0 }
 0x262   : > { %2126 = vmatprep.subr.bf16.mxu0 %v2673_v0 }
 0x264   : > { %2117 = vmatmul.mubr.msk.bf16.vlgmr.msra.gmra.mxu0 %vm918_vm3, %v831_v32 }
 0x265   : > { %2128 = vmatprep.mubr.msk.bf16.mxu0 %vm2674_vm0, %v2673_v0 }
 0x2cf   : > { %v960_v43 = vpop.f32.mrf.mxu1 }
 0x2d0   : > { %v1104_v45 = vmul.f32 0.35355338, %v960_v43 }
 0x2d1   : > { %v2100_v46 = vpop.f32.mrf.mxu1 }
 0x2d2   : > { %v1114_v47 = vadd.f32 %v2027_v44, %v1104_v45 }
 0x2d3   : > { %v963_v48 = vpop.f32.mrf.mxu1 }
 0x2d4   : > { %v1118_v49 = vsel %vm918_vm3, %v1114_v47, -inf }
 0x2d5   : > { %v2101_v50 = vpop.f32.mrf.mxu1  ;;  %1119 = vmax.xlane.f32.xlu1 %v1118_v49 }
 0x31c   : > { %v1006_v51 = vpop.f32.mrf.mxu0 }
 0x31d   : > { %v1105_v52 = vmul.f32 0.35355338, %v1006_v51 }
 0x31e   : > { %v2106_v53 = vpop.f32.mrf.mxu0 }
 0x31f   : > { %v1115_v54 = vadd.f32 %v2027_v44, %v1105_v52 }
 0x320   : > { %v1009_v55 = vpop.f32.mrf.mxu0  ;;  %v1052_v56 = vpop.f32.mrf.mxu1 }
 0x321   : > { %v1106_v57 = vmul.f32 0.35355338, %v1052_v56  ;;  %v1121_v58 = vsel %vm918_vm3, %v1115_v54, -inf }
 0x322   : > { %v2112_v59 = vpop.f32.mrf.mxu1  ;;  %1122 = vmax.xlane.f32.xlu0 %v1121_v58  ;;  %v2107_v60 = vpop.f32.mrf.mxu0 }
 0x323   : > { %v1116_v61 = vadd.f32 %v2027_v44, %v1106_v57 }
 0x324   : > { %v1055_v62 = vpop.f32.mrf.mxu1  ;;  %v1098_v63 = vpop.f32.mrf.mxu0 }
 0x325   : > { %v1107_v1 = vmul.f32 0.35355338, %v1098_v63  ;;  %v1124_v2 = vsel %vm918_vm3, %v1116_v61, -inf }
 0x326   : > { %v2113_v3 = vpop.f32.mrf.mxu1  ;;  %1125 = vmax.xlane.f32.xlu1 %v1124_v2  ;;  %v2118_v4 = vpop.f32.mrf.mxu0 }
 0x327   : > { %v1117_v5 = vadd.f32 %v2027_v44, %v1107_v1 }
 0x328   : > { %v1101_v7 = vpop.f32.mrf.mxu0 }
 0x329   : > { %v1127_v8 = vsel %vm918_vm3, %v1117_v5, -inf }
 0x32a   : > { %1128 = vmax.xlane.f32.xlu0 %v1127_v8  ;;  %v2119_v9 = vpop.f32.mrf.mxu0 }
 0x337   : > { %845 = vrot.lane.b32.xlu1 %v843_v12, %s2676_s22  ;;  %s2041_s22 = sshll.u32 %s3183_s12, 7 }
 0x35e   : > { %v1120_v13 = vpop.xlane.xlu1 %1119 }
 0x35f   : > { %v1130_v14 = vsub.f32 %v1114_v47, %v1120_v13 }
 0x361   : > { %v1134_v15 = vmul.f32 1.442695, %v1130_v14 }
 0x363   : > { %2306 = vpow2.f32 %v1134_v15  ;;  %v2678_v15 = vmov 1983009808  }
 0x370   : > { %v2307_v16 = vpop.eup %2306 }
 0x371   : > { %v1142_v17 = vsel %vm918_vm3, %v2307_v16, 0.0 }
 0x372   : > { %1143 = vadd.xlane.f32.xlu1 %v1142_v17  ;;  %v1547_v17 = vlaneseq }
 0x383   : > { %851 = vrot.lane.b32.xlu1 %v843_v12, %s2675_s14  ;;  %s3186_s14 = sld [smem:[#allocation36_spill]] }
 0x3a6   : > { %1166 = vxpose.xlu1.c.b16.start.end [1/1] (short) (narrow) %v843_v12, 16 }
 0x3ab   : > { %v1123_v18 = vpop.xlane.xlu0 %1122 }
 0x3ac   : > { %v1131_v19 = vsub.f32 %v1115_v54, %v1123_v18  ;;  %v2679_v18 = vmov 1934713408  }
 0x3ae   : > { %v1136_v20 = vmul.f32 1.442695, %v1131_v19  ;;  %v1577_v19 = vunpack.c.l.s4 %v2679_v18 }
 0x3af   : > { %v1126_v21 = vpop.xlane.xlu1 %1125 }
 0x3b0   : > { %2308 = vpow2.f32 %v1136_v20  ;;  %v1132_v22 = vsub.f32 %v1116_v61, %v1126_v21  ;;  %v1548_v21 = vshrl.u32 %v1547_v17, 7 }
 0x3b2   : > { %v1138_v23 = vmul.f32 1.442695, %v1132_v22 }
 0x3b3   : > { %v1129_v24 = vpop.xlane.xlu0 %1128  ;;  %v846_v33 = vpop.permute.xlu1 %845 }
 0x3b4   : > { %2310 = vpow2.f32 %v1138_v23  ;;  %v1133_v25 = vsub.f32 %v1117_v5, %v1129_v24  ;;  %v1578_v24 = vunpack.c.0.s8 %v1577_v19 }
 0x3b6   : > { %v1140_v26 = vmul.f32 1.442695, %v1133_v25 }
 0x3b8   : > { %2312 = vpow2.f32 %v1140_v26 }
 0x3bd   : > { %v2309_v27 = vpop.eup %2308 }
 0x3be   : > { %v1145_v28 = vsel %vm918_vm3, %v2309_v27, 0.0 }
 0x3bf   : > { %1146 = vadd.xlane.f32.xlu0 %v1145_v28 }
 0x3c1   : > { %v2311_v29 = vpop.eup %2310 }
 0x3c2   : > { %v1148_v30 = vsel %vm918_vm3, %v2311_v29, 0.0 }
 0x3c3   : > { %1149 = vadd.xlane.f32.xlu0 %v1148_v30 }
 0x3c5   : > { %v2313_v31 = vpop.eup %2312 }
 0x3c6   : > { %v1151_v32 = vsel %vm918_vm3, %v2313_v31, 0.0 }
 0x3c7   : > { %1152 = vadd.xlane.f32.xlu0 %v1151_v32 }
 0x3dd   : > { %848 = vrot.lane.b32.xlu0 %v843_v12, %s2677_s28  ;;  %s621_s28 = scalar_lea.vmem [#allocation17], %s2945_s16  ;;  %s2570_s16 = scalar_lea.vmem %s2569_s13, 256 }
 0x3de   : > { %s1809_s21 = sshll.u32 %s621_s28, 4  ;;  %s1810_s21 = int_to_ptr.vmem [resolvable:$true] %s1809_s21 }
 0x3df   : > { %s2564_s24 = scalar_lea.vmem %s1810_s21, 128  ;;  %p2571_p13 = scmp.lt.s32.totalorder %s1810_s21, %s2569_s13 }
 0x3e0   : > { %p2565_p1 = scmp.ne.s32.totalorder %s1810_s21, %s2564_s24  ;;  %p2572_p6 = scmp.lt.s32.totalorder %s2570_s16, %s2564_s24 }
 0x3e2   : > { %p2566_p10 = pnand %p2565_p1, %p3189_p12  ;;  %p2573_p2 = por %p2572_p6, %p2571_p13 }
 0x3e4   : > { %p2567_p7 = pneg %p2566_p10 }
 0x3e6   : > { %p2574_p11 = pnand %p2573_p2, %p2567_p7 }
 0x3fb   : > { %v1144_v34 = vpop.xlane.xlu1 %1143  ;;  %1182 = vxpose.xlu0.c.b16.start.end [1/1] (short) (narrow) %v846_v33, 16 }
 0x3fc   : > { %2314 = vrcp.f32 %v1144_v34 }
 0x3ff   : > { %v852_v39 = vpop.permute.xlu1 %851 }
 0x408   : > { %v1174_v40 = vpop.trf.xlu1 }
 0x409   : > { %v2315_v35 = vpop.eup %2314 }
 0x40a   : > { %v1158_v36 = vmul.f32 %v2315_v35, %v2307_v16  ;;  %v1545_v16 = vunpack.c.l.s4 %v2678_v15 }
 0x40c   : > { %v1162_v37 = vpack.c.bf16 %v1158_v36, %v1158_v36  ;;  %v1546_v20 = vunpack.c.0.s8 %v1545_v16  ;;  %v2304_v36 = vld [vmem:[%s3125_s9 + $0x8] sm:$0xff]  }
 0x40e   : > { %v1234_v38 = vsel %vm918_vm3, %v1162_v37, 0  ;;  %v1549_v25 = vsub.s32 %v1546_v20, %v1548_v21 }
 0x40f   : > { %2121 = vmatpush3.bf16.xpose.msra.mxu1 %v1234_v38 }
 0x410   : > { %2132 = vmatprep.subr.bf16.mxu1 %v2673_v0 }
 0x416   : > { %2123 = vmatmul.mubr.msk.bf16.vlgmr.msra.gmra.mxu1 %vm918_vm3, %v1174_v40 }
 0x417   : > { %2134 = vmatprep.mubr.msk.bf16.mxu1 %vm2674_vm0, %v2673_v0 }
 0x448   : > { %v1147_v41 = vpop.xlane.xlu0 %1146 }
 0x449   : > { %2316 = vrcp.f32 %v1147_v41 }
 0x44c   : > { %v1150_v42 = vpop.xlane.xlu0 %1149 }
 0x44d   : > { %2318 = vrcp.f32 %v1150_v42 }
 0x450   : > { %v1153_v43 = vpop.xlane.xlu0 %1152 }
 0x451   : > { %2320 = vrcp.f32 %v1153_v43 }
 0x454   : > { %v849_v44 = vpop.permute.xlu0 %848 }
 0x455   : > { %1198 = vxpose.xlu1.c.b16.start.end [1/1] (short) (narrow) %v849_v44, 16 }
 0x456   : > { %v2317_v45 = vpop.eup %2316 }
 0x457   : > { %v1159_v46 = vmul.f32 %v2317_v45, %v2309_v27  ;;  %v2305_v45 = vld [vmem:[%s3125_s9] sm:$0xff]  }
 0x459   : > { %1214 = vxpose.xlu1.c.b16.start.end [1/1] (short) (narrow) %v852_v39, 16  ;;  %v1163_v47 = vpack.c.bf16 %v1159_v46, %v1159_v46 }
 0x45a   : > { %v2319_v48 = vpop.eup %2318 }
 0x45b   : > { %v1280_v49 = vsel %vm918_vm3, %v1163_v47, 0  ;;  %v1160_v50 = vmul.f32 %v2319_v48, %v2311_v29 }
 0x45c   : > { %2127 = vmatpush3.bf16.xpose.msra.mxu0 %v1280_v49 }
 0x45d   : > { %v1164_v51 = vpack.c.bf16 %v1160_v50, %v1160_v50  ;;  %2138 = vmatprep.subr.bf16.mxu0 %v2673_v0  ;;  %v1190_v55 = vpop.trf.xlu0 }
 0x45e   : > { %v2321_v52 = vpop.eup %2320 }
 0x45f   : > { %v1326_v53 = vsel %vm918_vm3, %v1164_v51, 0  ;;  %v1161_v54 = vmul.f32 %v2321_v52, %v2313_v31  ;;  %v1581_v31 = vsub.s32 %v1578_v24, %v1548_v21 }
 0x460   : > { %2133 = vmatpush3.bf16.xpose.msra.mxu1 %v1326_v53 }
 0x461   : > { %v1165_v56 = vpack.c.bf16 %v1161_v54, %v1161_v54  ;;  %2144 = vmatprep.subr.bf16.mxu1 %v2673_v0 }
 0x463   : > { %2129 = vmatmul.mubr.msk.bf16.vlgmr.msra.gmra.mxu0 %vm918_vm3, %v1190_v55  ;;  %v1372_v57 = vsel %vm918_vm3, %v1165_v56, 0 }
 0x464   : > { %2139 = vmatpush3.bf16.xpose.msra.mxu0 %v1372_v57  ;;  %2140 = vmatprep.mubr.msk.bf16.mxu0 %vm2674_vm0, %v2673_v0 }
 0x4b7   : > { %v1206_v58 = vpop.trf.xlu1 }
 0x4b8   : > { %2135 = vmatmul.mubr.msk.bf16.vlgmr.msra.gmra.mxu1 %vm918_vm3, %v1206_v58 }
 0x4b9   : > { %2148 = vmatprep.mubr.msk.bf16.mxu1 %vm2674_vm0, %v2673_v0  ;;  %2145 = vmatpush3.bf16.msra.mxu1 %v2304_v36 }
 0x4ba   : > { %2146 = vmatprep.subr.bf16.mxu1 %v2673_v0 }
 0x4bb   : > { %v1222_v59 = vpop.trf.xlu1 }
 0x4bc   : > { %2141 = vmatmul.mubr.msk.bf16.vlgmr.msra.gmra.mxu0 %vm918_vm3, %v1222_v59 }
 0x4bd   : > { %2147 = vmatpush3.bf16.msra.mxu1 %v2305_v45 }
 0x4d6   : > { %v1270_v60 = vpop.f32.mrf.mxu1 }
 0x4d7   : > { %1414 = vxpose.xlu0.b32.start.end [1/1] (short) (narrow) %v1270_v60, 8 }
 0x4d8   : > { %v2124_v61 = vpop.f32.mrf.mxu1 }
 0x4da   : > { %v1273_v62 = vpop.f32.mrf.mxu1 }
 0x4dc   : > { %v2125_v63 = vpop.f32.mrf.mxu1 }
 0x523   : > { %v1316_v1 = vpop.f32.mrf.mxu0 }
 0x524   : > { %1446 = vxpose.xlu1.b32.start.end [1/1] (short) (narrow) %v1316_v1, 8 }
 0x525   : > { %v2130_v2 = vpop.f32.mrf.mxu0 }
 0x527   : > { %v1319_v3 = vpop.f32.mrf.mxu0 }
 0x529   : > { %v2131_v4 = vpop.f32.mrf.mxu0 }
 0x553   : > { %v1430_v14 = vpop.trf.xlu0 }
 0x578   : > { %v1362_v5 = vpop.f32.mrf.mxu1 }
 0x579   : > { %1478 = vxpose.xlu0.b32.start.end [1/1] (short) (narrow) %v1362_v5, 8 }
 0x57a   : > { %v2136_v7 = vpop.f32.mrf.mxu1 }
 0x57c   : > { %v1365_v8 = vpop.f32.mrf.mxu1  ;;  %v1408_v9 = vpop.f32.mrf.mxu0 }
 0x57d   : > { %1510 = vxpose.xlu0.b32.start.end [1/1] (short) (narrow) %v1408_v9, 8 }
 0x57e   : > { %v2137_v10 = vpop.f32.mrf.mxu1  ;;  %v2142_v11 = vpop.f32.mrf.mxu0 }
 0x57f   : > { %v2034_v10 = vld [vmem:[%s3126_s10] ss:$0 sm:$0xff] }
 0x580   : > { %v1411_v12 = vpop.f32.mrf.mxu0 }
 0x582   : > { %v2143_v13 = vpop.f32.mrf.mxu0 }
 0x5a0   : > { %v1462_v23 = vpop.trf.xlu1 }
 0x5f5   : > { %v1494_v22 = vpop.trf.xlu0 }
 0x5f6   : > { %v1542_v26 = vcombine.low %v1430_v14, %v1494_v22  ;;  %v1543_v27 = vcombine.high %v1430_v14, %v1494_v22 }
 0x5f8   : > { %v1550_v32 = vrot.slane %v1542_v26, %v1549_v25  ;;  %v1557_v33 = vrot.slane %v1543_v27, %v1549_v25  ;;  %v2038_v26 = vld [vmem:[%s3185_s19] ss:$0 sm:$0xff] }
 0x5f9   : > { %v1526_v28 = vpop.trf.xlu0 }
 0x5fa   : > { %v1558_v29 = vcombine.low %v1462_v23, %v1526_v28  ;;  %v1559_v30 = vcombine.high %v1462_v23, %v1526_v28  ;;  %v2039_v28 = vld [vmem:[%s3186_s14] ss:$0 sm:$0xff] }
 0x5fc   : > { %v1566_v34 = vrot.slane %v1558_v29, %v1549_v25  ;;  %v1573_v35 = vrot.slane %v1559_v30, %v1549_v25 }
 0x5fe   : > { %v1574_v37 = vcombine.low %v1550_v32, %v1566_v34  ;;  %v1575_v38 = vcombine.high %v1550_v32, %v1566_v34  ;;  %v1590_v39 = vcombine.low %v1557_v33, %v1573_v35  ;;  %v1591_v40 = vcombine.high %v1557_v33, %v1573_v35 }
 0x600   : > { %v1582_v41 = vrot.slane %v1574_v37, %v1581_v31  ;;  %v1589_v42 = vrot.slane %v1575_v38, %v1581_v31  ;;  %v1598_v43 = vrot.slane %v1590_v39, %v1581_v31  ;;  %v1605_v44 = vrot.slane %v1591_v40, %v1581_v31 }
 0x602   : > { %v1610_v46 = vcombine.low %v1582_v41, %v1589_v42  ;;  %v2032_v47 = vcombine.high %v1582_v41, %v1589_v42  ;;  %v1626_v48 = vcombine.low %v1598_v43, %v1605_v44  ;;  %v2033_v49 = vcombine.high %v1598_v43, %v1605_v44 }
 0x604   : > { %v1617_v50 = vrot.slane %v1610_v46, %v1549_v25  ;;  %v1625_v51 = vrot.slane %v2032_v47, %v1549_v25  ;;  %v1633_v52 = vrot.slane %v1626_v48, %v1549_v25  ;;  %v1641_v53 = vrot.slane %v2033_v49, %v1549_v25 }
 0x606   : > { %v1643_v54 = vcombine.high %v1617_v50, %v1625_v51  ;;  %v1659_v55 = vcombine.high %v1633_v52, %v1641_v53  ;;  %v1642_v56 = vcombine.low %v1617_v50, %v1625_v51  ;;  %v1658_v57 = vcombine.low %v1633_v52, %v1641_v53 }
 0x608   : > { %v1657_v58 = vrot.slane %v1643_v54, %v1581_v31  ;;  %v1673_v59 = vrot.slane %v1659_v55, %v1581_v31  ;;  %v1650_v0 = vrot.slane %v1642_v56, %v1581_v31  ;;  %v1666_v60 = vrot.slane %v1658_v57, %v1581_v31 }
 0x60a   : > { %v1676_v61 = vcombine.low %v1657_v58, %v1673_v59  ;;  %v1675_v62 = vcombine.high %v1650_v0, %v1666_v60  ;;  %v1674_v63 = vcombine.low %v1650_v0, %v1666_v60  ;;  %v1677_v1 = vcombine.high %v1657_v58, %v1673_v59 }
 0x60c   : > { %1683 = vrot.lane.b32.xlu0 %v1676_v61, %s2680_s27  ;;  %1679 = vrot.lane.b32.xlu1 %v1675_v62, %s2681_s23  ;;  %s3188_s23 = smov %s3187_s30  ;;  %s1807_s27 = scalar_lea.hbm %s3187_s30, %s2041_s22 }
 0x610   : > { %1687 = vrot.lane.b32.xlu1 %v1677_v1, %s2682_s20  ;;  %s1795_s20 = scalar_lea.sflag [#allocation4], %s2942_s17 }
 0x67e   : > { %v1680_v2 = vpop.permute.xlu1 %1679  ;;  %v1684_v3 = vpop.permute.xlu0 %1683 }
 0x67f   : > { %v1690_v4 = vsel %vm918_vm3, %v1674_v63, %v1680_v2 }
 0x680   : > { %v1692_v7 = vsel %vm1691_vm4, %v1690_v4, %v1684_v3 }
 0x682   : > { %v1688_v5 = vpop.permute.xlu1 %1687 }
 0x683   : > { %v1694_v8 = vsel %vm1693_vm5, %v1692_v7, %v1688_v5 }
 0x684   : > { %v1695_v9 = vpack.c.bf16 %v1694_v8, %v1694_v8 }
 0x686   : > { %2149 = vmatmul.mubr.msk.bf16.vlgmr.msra.gmra.mxu1 %vm651_vm1, %v1695_v9 }
 0x746   : > { %v1756_v11 = vpop.f32.mrf.mxu1 }
 0x747   : > { %v1757_v12 = vadd.f32 %v2034_v10, %v1756_v11 }
 0x748   : > { %v2150_v13 = vpop.f32.mrf.mxu1 }
 0x749   : > { %v1762_v14 = vadd.f32 %v1757_v12, %v2979_v6 }
 0x74a   : > { %v1759_v15 = vpop.f32.mrf.mxu1 }
 0x74b   : > { %v1763_v16 = vsel %vm651_vm1, %v1762_v14, 0.0 }
 0x74c   : > { %1764 = vadd.xlane.f32.xlu1 %v1763_v16  ;;  %v2151_v17 = vpop.f32.mrf.mxu1 }
 0x7d5   : > { %v1765_v18 = vpop.xlane.xlu1 %1764 }
 0x7d6   : > { %v1767_v19 = vmul.f32 0.03125, %v1765_v18 }
 0x7d8   : > { %v1768_v20 = vsub.f32 %v1762_v14, %v1767_v19 }
 0x7da   : > { %v1769_v21 = vmul.f32 %v1768_v20, %v1768_v20 }
 0x7dc   : > { %v1770_v22 = vsel %vm651_vm1, %v1769_v21, 0.0 }
 0x7dd   : > { %1771 = vadd.xlane.f32.xlu0 %v1770_v22 }
 0x866   : > { %v1772_v23 = vpop.xlane.xlu0 %1771 }
 0x867   : > { %v1773_v24 = vmul.f32 0.03125, %v1772_v23 }
 0x869   : > { %v1774_v25 = vadd.f32 1e-12, %v1773_v24 }
 0x86b   : > { %2322 = vrsqrt.f32 %v1774_v25 }
 0x878   : > { %v2323_v6 = vpop.eup %2322 }
 0x879   : > { %v1776_v27 = vmul.f32 %v2323_v6, %v1768_v20 }
 0x87b   : > { %v1784_v29 = vmul.f32 %v2038_v26, %v1776_v27 }
 0x87d   : > { %v1792_v30 = vadd.f32 %v2039_v28, %v1784_v29 }
 0x87f   : > { %1793 = vst.msk [vmem:[%s621_s28] sm:$0xff] %vm651_vm1, %v1792_v30 }
 0x880   : > { %2577 = shalt.err (!%p2574_p11)
}
 0x881   : > { %s2578_s12 = scalar_lea.hbm %s1807_s27, 128  ;;  %s2582_s19 = scalar_lea.hbm %s3188_s23, 256 }
 0x882   : > { %p2579_p5 = scmp.ne.s32.totalorder %s1807_s27, %s2578_s12  ;;  %p2583_p4 = scmp.lt.s32.totalorder %s1807_s27, %s3188_s23 }
 0x883   : > { %p2584_p8 = scmp.lt.s32.totalorder %s2582_s19, %s2578_s12 }
 0x884   : > { %p2580_p3 = pnand %p2579_p5, %p3189_p12 }
 0x885   : > { %p2585_p9 = por %p2584_p8, %p2583_p4 }
 0x886   : > { %p2581_p0 = pneg %p2580_p3 }
 0x888   : > { %p2586_p1 = pnand %p2585_p9, %p2581_p0 }
 0x88a   : > { %2589 = shalt.err (!%p2586_p1)
}
 0x88b   : > { %2182 = dma.vmem_to_hbm [thread:$0]  (%p3189_p12), %s1810_s21, 128, %s1807_s27, %s1795_s20  }
 0x88c PF: > { %s3190_s14 = sld [smem:[#allocation24_spill]] }
 0x88d   : > { %s3191_s22 = sld [smem:[#allocation31_spill]] }
 0x88e   : > { %s3192_s28 = sld [smem:[#allocation27_spill]] }
 0x892   : > { %s1821_s3 = sand.u32 1, %s3190_s14  }
 0x893   : > { %p3193_p10 = scmp.ne.s32.totalorder %s3191_s22, 0  ;;  %s1822_s5 = scalar_lea.sflag [#allocation4], %s1821_s3 }
 0x894   : > { %p3194_p7 = scmp.ge.s32.totalorder %s3192_s28, 2 }
 0x896   : > { %p2214_p13 = pnand %p3194_p7, %p3193_p10 }
 0x898   : > { %p2215_p6 = pneg %p2214_p13 }
 0x89a   : > { %2635 = dma.done.wait (%p2215_p6), %s1822_s5, 128  }
 0x89b   : > { %2637 = vsyncadd (%p2215_p6), %s1822_s5, 4294967168  ;;  %s35_s30 = sadd.s32 1, %s3192_s28   ;;  %s3195_s24 = sld [smem:[#allocation25_spill]] }
 0x89c   : > { %p32_p2 = scmp.ge.s32.totalorder %s35_s30, 4   ;;  %s3196_s27 = sld [smem:[#allocation30_spill]] }
 0x89d   : > { %s3197_s7 = sld [smem:[#allocation28_spill]]  ;;  %s3198_s25 = smov %s2644_s26 }
 0x89e   : > { %s3200_s28 = smov %s2656_s29 }
 0x89f   :  { %34 = sbr.rel (!%p32_p2) target bundleno = 18 (0x12), region = 165 }
 0x8a1   : > { %s3199_s26 = smov %s3195_s24 }
 0x8a3   : > { %s3201_s29 = smov %s3197_s7 }
 0x8a4   :  { %1827 = vsyncpa [#allocation3], 1 }
 0x8a5   :  { %1829 = vsyncpa [#allocation3 + $0x1], 1 }
 0x8a6   :  { %1830 = vsyncpa [#allocation6], 1 }
 0x8a7   :  { %1832 = vsyncpa [#allocation6 + $0x1], 1 }
 0x8a8   :  { %1833 = vsyncpa [#allocation9], 1 }
 0x8a9   :  { %1834 = vsyncpa [#allocation12], 1 }
 0x8aa   :  { %1835 = vsyncpa [#allocation15], 1 }
 0x8ab   :  { %1836 = vsyncpa [#allocation4], 1 }
 0x8ac   :  { %1838 = vsyncpa [#allocation4 + $0x1], 1 }

</bundles_post_ra>
